<compile_context>
chip_gen: v6e
topology: v6e:2x2x1
jax: 0.10.0
libtpu: 0.0.40
codegen_flags: <defaults>
</compile_context>

<pallas_src>
import functools
import math

import jax
import jax.numpy as jnp
from jax.experimental import pallas as pl
from jax.experimental.pallas import tpu as pltpu

INPUT_DIM = 3072          # 3 * 32 * 32 (fixed by nn.Linear(3072, hidden))
HIDDEN_DIM = 128
NUM_CLASSES = 10
FF_NUM_LAYERS = 2
BP_NUM_LAYERS = 2
LN_EPS = 1e-8

MAX_TB = 1024                       # rows per batch tile (f32 x tile = 12 MiB)
VMEM_LIMIT_BYTES = 48 * 1024 * 1024  # fits v5e/v6e/v7x; leaves headroom on v7x's 64 MiB


# ---------------------------------------------------------------------------
# Pallas kernel: the whole MLP hot path for one batch tile.
# ---------------------------------------------------------------------------
def _hybrid_kernel(n_ff, n_bp, x_ref, w0_ref, wstk_ref, bstk_ref, out_ref):
    """MLP forward for one batch tile.

    x_ref   : (TB, 3072)    f32   flattened image tile (cast to bf16 in-kernel)
    w0_ref  : (3072, 128)   bf16  first FF weight, stored (in, out)
    wstk_ref: (L, 128, 128) bf16  remaining weights [ff_1.., bp_0.., final (zero-padded)]
    bstk_ref: (L+1, 128)    f32   all biases, final one zero-padded to 128 lanes
    out_ref : (TB, 128)     bf16  lane-dense padded logits (first 10 columns valid)
    """
    # Explicit f32 -> bf16 cast of the x tile (VPU work hidden under the x DMA); the
    # cast MUST be explicit so the dot runs bf16 x bf16 with f32 MXU accumulation.
    x_bf = x_ref[...].astype(jnp.bfloat16)
    h = jnp.dot(x_bf, w0_ref[...], preferred_element_type=jnp.float32)
    h = jnp.maximum(h + bstk_ref[0:1, :], 0.0)          # relu_full_grad forward == ReLU

    s = 0
    # Remaining FF feature layers: Linear -> ReLU.
    for _ in range(n_ff - 1):
        h = jnp.dot(h.astype(jnp.bfloat16), wstk_ref[s],
                    preferred_element_type=jnp.float32)
        h = jnp.maximum(h + bstk_ref[s + 1:s + 2, :], 0.0)
        s += 1

    # _layer_norm (Forward-Forward RMS normalization), kept entirely in f32.
    rms = jnp.sqrt(jnp.mean(h * h, axis=-1, keepdims=True))
    h = h * pl.reciprocal(rms + LN_EPS, approx=False)   # exact recip on the EUP

    # BP classifier layers: Linear -> ReLU.
    for _ in range(n_bp):
        h = jnp.dot(h.astype(jnp.bfloat16), wstk_ref[s],
                    preferred_element_type=jnp.float32)
        h = jnp.maximum(h + bstk_ref[s + 1:s + 2, :], 0.0)
        s += 1

    # Final classifier (no activation); output columns 10..127 are zero padding.
    logits = jnp.dot(h.astype(jnp.bfloat16), wstk_ref[s],
                     preferred_element_type=jnp.float32)
    out_ref[...] = (logits + bstk_ref[s + 1:s + 2, :]).astype(jnp.bfloat16)


# ---------------------------------------------------------------------------
# Wrapper: parameter packing + batch-tiled pallas_call.
# ---------------------------------------------------------------------------
def _round_up(x, m):
    return ((x + m - 1) // m) * m


def _choose_tile(B):
    """>=2 grid steps (both v7x TCs busy), tile rows a multiple of 8, capped at MAX_TB."""
    tb = _round_up(max(1, (B + 1) // 2), 8)
    return min(tb, MAX_TB)


def _pack_params(params):
    """params: list of (W (in,out) f32, b (1,out) f32). Returns bf16/f32 packed operands."""
    w0, b0 = params[0]
    hidden = params[1:-1]
    wf, bf = params[-1]
    pad = HIDDEN_DIM - wf.shape[1]
    wf_p = jnp.pad(wf, ((0, 0), (0, pad)))              # (128, 128), zero-padded cols
    bf_p = jnp.pad(bf, ((0, 0), (0, pad)))              # (1, 128)

    w0_b = w0.astype(jnp.bfloat16)                      # (3072, 128) bf16
    w_stack = jnp.stack(
        [w.astype(jnp.bfloat16) for w, _ in hidden] + [wf_p.astype(jnp.bfloat16)],
        axis=0)                                         # (L, 128, 128) bf16
    b_stack = jnp.concatenate(
        [b0] + [b for _, b in hidden] + [bf_p], axis=0).astype(jnp.float32)  # (L+1, 128)
    return w0_b, w_stack, b_stack


def hybrid_forward_logits(x_flat, params):
    """x_flat: (B, 3072) f32. Returns (B, 10) f32 logits."""
    B = x_flat.shape[0]
    w0_b, w_stack, b_stack = _pack_params(params)
    n_stack = w_stack.shape[0]
    n_bias = b_stack.shape[0]

    TB = _choose_tile(B)
    B_pad = _round_up(B, TB)
    if B_pad != B:
        x_flat = jnp.pad(x_flat, ((0, B_pad - B), (0, 0)))   # tail tile only; no cast pass
    num_tiles = B_pad // TB

    kernel = functools.partial(_hybrid_kernel, FF_NUM_LAYERS, BP_NUM_LAYERS)
    logits_pad = pl.pallas_call(
        kernel,
        out_shape=jax.ShapeDtypeStruct((B_pad, HIDDEN_DIM), jnp.bfloat16),
        grid_spec=pltpu.PrefetchScalarGridSpec(
            num_scalar_prefetch=0,
            grid=(num_tiles,),
            in_specs=[
                pl.BlockSpec((TB, INPUT_DIM), lambda i: (i, 0)),            # x tile (f32)
                pl.BlockSpec((INPUT_DIM, HIDDEN_DIM), lambda i: (0, 0)),    # W0 resident
                pl.BlockSpec((n_stack, HIDDEN_DIM, HIDDEN_DIM),
                             lambda i: (0, 0, 0)),                          # stacked Ws
                pl.BlockSpec((n_bias, HIDDEN_DIM), lambda i: (0, 0)),       # stacked bs
            ],
            out_specs=pl.BlockSpec((TB, HIDDEN_DIM), lambda i: (i, 0)),     # lane-dense
        ),
        compiler_params=pltpu.CompilerParams(
            dimension_semantics=("parallel",),      # megacore-shard the batch on v7x
            vmem_limit_bytes=VMEM_LIMIT_BYTES),     # room for TB=1024 f32 x double-buffer
    )(x_flat, w0_b, w_stack, b_stack)
    return logits_pad[:B, :NUM_CLASSES].astype(jnp.float32)


# ---------------------------------------------------------------------------
# Glue: parameter init (matches nn.Linear default U(-1/sqrt(fan_in), +..)) and
# loss / accuracy bookkeeping (tiny reductions, kept in plain JAX).
# ---------------------------------------------------------------------------
def init_linear(key, fan_in, fan_out):
    kw, kb = jax.random.split(key)
    bound = 1.0 / math.sqrt(fan_in)
    w = jax.random.uniform(kw, (fan_in, fan_out), jnp.float32, -bound, bound)
    b = jax.random.uniform(kb, (1, fan_out), jnp.float32, -bound, bound)
    return w, b


def init_params(key):
    dims = [INPUT_DIM] + [HIDDEN_DIM] * FF_NUM_LAYERS          # FF layers
    dims = dims + [HIDDEN_DIM] * BP_NUM_LAYERS                 # BP layers
    dims = dims + [NUM_CLASSES]                                # final classifier
    params = []
    for i in range(len(dims) - 1):
        key, sub = jax.random.split(key)
        params.append(init_linear(sub, dims[i], dims[i + 1]))
    return params


@jax.jit
def hybrid_model_forward(neutral_sample, class_labels, params):
    B = neutral_sample.shape[0]
    x = neutral_sample.reshape(B, -1)                          # (B, 3072), f32
    logits = hybrid_forward_logits(x, params)                  # Pallas hot path

    # CrossEntropyLoss(reduction='mean')  -- tiny (B,10) reductions in f32, left to XLA.
    logp = logits - jax.nn.logsumexp(logits, axis=-1, keepdims=True)
    nll = -jnp.take_along_axis(logp, class_labels[:, None], axis=-1)[:, 0]
    classification_loss = jnp.mean(nll)

    preds = jnp.argmax(logits, axis=-1)
    accuracy = jnp.mean((preds == class_labels).astype(jnp.float32))

    return {
        "Loss": jnp.zeros((1,), jnp.float32) + classification_loss,
        "classification_loss": classification_loss,
        "classification_accuracy": accuracy,
    }, logits


# ---------------------------------------------------------------------------
# Pure-JAX references for sanity checking.
# ---------------------------------------------------------------------------
def _reference_logits_bf16(x_flat, params):
    """Mirrors the kernel's bf16 storage / f32 accumulation / bf16 output exactly."""
    w0_b, w_stack, b_stack = _pack_params(params)
    h = jnp.dot(x_flat.astype(jnp.bfloat16), w0_b, preferred_element_type=jnp.float32)
    h = jnp.maximum(h + b_stack[0:1], 0.0)
    s = 0
    for _ in range(FF_NUM_LAYERS - 1):
        h = jnp.dot(h.astype(jnp.bfloat16), w_stack[s], preferred_element_type=jnp.float32)
        h = jnp.maximum(h + b_stack[s + 1:s + 2], 0.0)
        s += 1
    h = h / (jnp.sqrt(jnp.mean(h * h, axis=-1, keepdims=True)) + LN_EPS)
    for _ in range(BP_NUM_LAYERS):
        h = jnp.dot(h.astype(jnp.bfloat16), w_stack[s], preferred_element_type=jnp.float32)
        h = jnp.maximum(h + b_stack[s + 1:s + 2], 0.0)
        s += 1
    logits = jnp.dot(h.astype(jnp.bfloat16), w_stack[s],
                     preferred_element_type=jnp.float32) + b_stack[s + 1:s + 2]
    return logits.astype(jnp.bfloat16)[:, :NUM_CLASSES].astype(jnp.float32)


def _reference_logits_f32(x_flat, params):
    """Full-precision reference matching the original PyTorch semantics."""
    h = x_flat
    idx = 0
    for _ in range(FF_NUM_LAYERS):
        w, b = params[idx]; idx += 1
        h = jnp.maximum(h @ w + b, 0.0)
    h = h / (jnp.sqrt(jnp.mean(h * h, axis=-1, keepdims=True)) + LN_EPS)
    for _ in range(BP_NUM_LAYERS):
        w, b = params[idx]; idx += 1
        h = jnp.maximum(h @ w + b, 0.0)
    w, b = params[idx]
    return h @ w + b


if __name__ == "__main__":
    key = jax.random.PRNGKey(0)
    k_params, k_x, k_y = jax.random.split(key, 3)

    params = init_params(k_params)

    B = 12  # deliberately not a multiple of 8/tile to exercise the batch-padding path
    neutral_sample = jax.random.normal(k_x, (B, 3, 32, 32), dtype=jnp.float32)  # NCHW
    class_labels = jax.random.randint(k_y, (B,), 0, NUM_CLASSES, dtype=jnp.int32)

    scalar_outputs, logits = hybrid_model_forward(neutral_sample, class_labels, params)
    jax.block_until_ready(scalar_outputs)

    x_flat = neutral_sample.reshape(B, -1)
    ref_b = _reference_logits_bf16(x_flat, params)     # same bf16 recipe -> tight match
    ref_f = _reference_logits_f32(x_flat, params)      # original f32 semantics -> loose match
    assert logits.shape == (B, NUM_CLASSES)
    assert jnp.allclose(logits, ref_b, rtol=2e-2, atol=2e-2), "Pallas kernel mismatch (bf16 ref)"
    assert jnp.allclose(logits, ref_f, rtol=1e-1, atol=1e-1), "Pallas kernel drifted from f32 ref"
    assert scalar_outputs["Loss"].shape == (1,)
    assert 0.0 <= float(scalar_outputs["classification_accuracy"]) <= 1.0

    print("KERNEL_OK")
</pallas_src>

<mosaic_0001>
module attributes {stable_mosaic.version = 11 : i64} {
  func.func @_hybrid_kernel(%arg0: i32, %arg1: memref<8x3072xf32, #tpu.memory_space<vmem>>, %arg2: memref<3072x128xbf16, #tpu.memory_space<vmem>>, %arg3: memref<4x128x128xbf16, #tpu.memory_space<vmem>>, %arg4: memref<5x128xf32, #tpu.memory_space<vmem>>, %arg5: memref<8x128xbf16, #tpu.memory_space<vmem>>) attributes {dimension_semantics = [#tpu.dimension_semantics<parallel>], iteration_bounds = array<i64: 2>, scalar_prefetch = 0 : i64, scratch_operands = 0 : i64, tpu.core_type = #tpu.core_type<tc>, window_params = [{transform_indices = @transform_0, window_bounds = array<i64: 8, 3072>}, {pipeline_mode = #tpu.pipeline_mode<synchronous>, transform_indices = @transform_1, window_bounds = array<i64: 3072, 128>}, {pipeline_mode = #tpu.pipeline_mode<synchronous>, transform_indices = @transform_2, window_bounds = array<i64: 4, 128, 128>}, {pipeline_mode = #tpu.pipeline_mode<synchronous>, transform_indices = @transform_3, window_bounds = array<i64: 5, 128>}, {transform_indices = @transform_4, window_bounds = array<i64: 8, 128>}]} {
    %c0 = arith.constant 0 : index
    %c0_0 = arith.constant 0 : index
    %0 = vector.load %arg1[%c0, %c0_0] : memref<8x3072xf32, #tpu.memory_space<vmem>>, vector<8x3072xf32>
    %1 = arith.truncf %0 : vector<8x3072xf32> to vector<8x3072xbf16>
    %c0_1 = arith.constant 0 : index
    %c0_2 = arith.constant 0 : index
    %2 = vector.load %arg2[%c0_1, %c0_2] : memref<3072x128xbf16, #tpu.memory_space<vmem>>, vector<3072x128xbf16>
    %cst = arith.constant dense<0.000000e+00> : vector<8x128xf32>
    %3 = tpu.matmul %1, %2, %cst {dimension_numbers = #tpu.dot_dimension_numbers<[1], [0], [0], [1], [0, 0, 1, 1], [], []>} : vector<8x3072xbf16>, vector<3072x128xbf16>, vector<8x128xf32> -> vector<8x128xf32>
    %c0_3 = arith.constant 0 : index
    %c0_4 = arith.constant 0 : index
    %4 = vector.load %arg4[%c0_3, %c0_4] : memref<5x128xf32, #tpu.memory_space<vmem>>, vector<1x128xf32>
    %5 = vector.broadcast %4 : vector<1x128xf32> to vector<8x128xf32>
    %6 = arith.addf %3, %5 : vector<8x128xf32>
    %cst_5 = arith.constant 0.000000e+00 : f32
    %7 = vector.broadcast %cst_5 : f32 to vector<8x128xf32>
    %8 = arith.maximumf %6, %7 : vector<8x128xf32>
    %9 = arith.truncf %8 : vector<8x128xf32> to vector<8x128xbf16>
    %c0_6 = arith.constant 0 : index
    %c0_7 = arith.constant 0 : index
    %c0_8 = arith.constant 0 : index
    %10 = vector.load %arg3[%c0_6, %c0_7, %c0_8] : memref<4x128x128xbf16, #tpu.memory_space<vmem>>, vector<1x128x128xbf16>
    %11 = vector.shape_cast %10 : vector<1x128x128xbf16> to vector<128x128xbf16>
    %cst_9 = arith.constant dense<0.000000e+00> : vector<8x128xf32>
    %12 = tpu.matmul %9, %11, %cst_9 {dimension_numbers = #tpu.dot_dimension_numbers<[1], [0], [0], [1], [0, 0, 1, 1], [], []>} : vector<8x128xbf16>, vector<128x128xbf16>, vector<8x128xf32> -> vector<8x128xf32>
    %c1 = arith.constant 1 : index
    %c0_10 = arith.constant 0 : index
    %13 = vector.load %arg4[%c1, %c0_10] : memref<5x128xf32, #tpu.memory_space<vmem>>, vector<1x128xf32>
    %14 = vector.broadcast %13 : vector<1x128xf32> to vector<8x128xf32>
    %15 = arith.addf %12, %14 : vector<8x128xf32>
    %cst_11 = arith.constant 0.000000e+00 : f32
    %16 = vector.broadcast %cst_11 : f32 to vector<8x128xf32>
    %17 = arith.maximumf %15, %16 : vector<8x128xf32>
    %18 = arith.mulf %17, %17 : vector<8x128xf32>
    %cst_12 = arith.constant dense<0.000000e+00> : vector<8xf32>
    %19 = vector.multi_reduction <add>, %18, %cst_12 [1] : vector<8x128xf32> to vector<8xf32>
    %20 = vector.shape_cast %19 : vector<8xf32> to vector<8x1xf32>
    %cst_13 = arith.constant 1.280000e+02 : f32
    %21 = vector.broadcast %cst_13 : f32 to vector<8x1xf32>
    %22 = arith.divf %20, %21 : vector<8x1xf32>
    %23 = math.sqrt %22 : vector<8x1xf32>
    %cst_14 = arith.constant 9.99999993E-9 : f32
    %24 = vector.broadcast %cst_14 : f32 to vector<8x1xf32>
    %25 = arith.addf %23, %24 : vector<8x1xf32>
    %26 = tpu.reciprocal %25 : vector<8x1xf32> -> vector<8x1xf32>
    %27 = vector.broadcast %26 : vector<8x1xf32> to vector<8x128xf32>
    %28 = arith.mulf %17, %27 : vector<8x128xf32>
    %29 = arith.truncf %28 : vector<8x128xf32> to vector<8x128xbf16>
    %c1_15 = arith.constant 1 : index
    %c0_16 = arith.constant 0 : index
    %c0_17 = arith.constant 0 : index
    %30 = vector.load %arg3[%c1_15, %c0_16, %c0_17] : memref<4x128x128xbf16, #tpu.memory_space<vmem>>, vector<1x128x128xbf16>
    %31 = vector.shape_cast %30 : vector<1x128x128xbf16> to vector<128x128xbf16>
    %cst_18 = arith.constant dense<0.000000e+00> : vector<8x128xf32>
    %32 = tpu.matmul %29, %31, %cst_18 {dimension_numbers = #tpu.dot_dimension_numbers<[1], [0], [0], [1], [0, 0, 1, 1], [], []>} : vector<8x128xbf16>, vector<128x128xbf16>, vector<8x128xf32> -> vector<8x128xf32>
    %c2 = arith.constant 2 : index
    %c0_19 = arith.constant 0 : index
    %33 = vector.load %arg4[%c2, %c0_19] : memref<5x128xf32, #tpu.memory_space<vmem>>, vector<1x128xf32>
    %34 = vector.broadcast %33 : vector<1x128xf32> to vector<8x128xf32>
    %35 = arith.addf %32, %34 : vector<8x128xf32>
    %cst_20 = arith.constant 0.000000e+00 : f32
    %36 = vector.broadcast %cst_20 : f32 to vector<8x128xf32>
    %37 = arith.maximumf %35, %36 : vector<8x128xf32>
    %38 = arith.truncf %37 : vector<8x128xf32> to vector<8x128xbf16>
    %c2_21 = arith.constant 2 : index
    %c0_22 = arith.constant 0 : index
    %c0_23 = arith.constant 0 : index
    %39 = vector.load %arg3[%c2_21, %c0_22, %c0_23] : memref<4x128x128xbf16, #tpu.memory_space<vmem>>, vector<1x128x128xbf16>
    %40 = vector.shape_cast %39 : vector<1x128x128xbf16> to vector<128x128xbf16>
    %cst_24 = arith.constant dense<0.000000e+00> : vector<8x128xf32>
    %41 = tpu.matmul %38, %40, %cst_24 {dimension_numbers = #tpu.dot_dimension_numbers<[1], [0], [0], [1], [0, 0, 1, 1], [], []>} : vector<8x128xbf16>, vector<128x128xbf16>, vector<8x128xf32> -> vector<8x128xf32>
    %c3 = arith.constant 3 : index
    %c0_25 = arith.constant 0 : index
    %42 = vector.load %arg4[%c3, %c0_25] : memref<5x128xf32, #tpu.memory_space<vmem>>, vector<1x128xf32>
    %43 = vector.broadcast %42 : vector<1x128xf32> to vector<8x128xf32>
    %44 = arith.addf %41, %43 : vector<8x128xf32>
    %cst_26 = arith.constant 0.000000e+00 : f32
    %45 = vector.broadcast %cst_26 : f32 to vector<8x128xf32>
    %46 = arith.maximumf %44, %45 : vector<8x128xf32>
    %47 = arith.truncf %46 : vector<8x128xf32> to vector<8x128xbf16>
    %c3_27 = arith.constant 3 : index
    %c0_28 = arith.constant 0 : index
    %c0_29 = arith.constant 0 : index
    %48 = vector.load %arg3[%c3_27, %c0_28, %c0_29] : memref<4x128x128xbf16, #tpu.memory_space<vmem>>, vector<1x128x128xbf16>
    %49 = vector.shape_cast %48 : vector<1x128x128xbf16> to vector<128x128xbf16>
    %cst_30 = arith.constant dense<0.000000e+00> : vector<8x128xf32>
    %50 = tpu.matmul %47, %49, %cst_30 {dimension_numbers = #tpu.dot_dimension_numbers<[1], [0], [0], [1], [0, 0, 1, 1], [], []>} : vector<8x128xbf16>, vector<128x128xbf16>, vector<8x128xf32> -> vector<8x128xf32>
    %c4 = arith.constant 4 : index
    %c0_31 = arith.constant 0 : index
    %51 = vector.load %arg4[%c4, %c0_31] : memref<5x128xf32, #tpu.memory_space<vmem>>, vector<1x128xf32>
    %52 = vector.broadcast %51 : vector<1x128xf32> to vector<8x128xf32>
    %53 = arith.addf %50, %52 : vector<8x128xf32>
    %54 = arith.truncf %53 : vector<8x128xf32> to vector<8x128xbf16>
    %c0_32 = arith.constant 0 : index
    %c0_33 = arith.constant 0 : index
    %55 = vector.load %arg5[%c0_32, %c0_33] : memref<8x128xbf16, #tpu.memory_space<vmem>>, vector<8x128xbf16>
    tpu.vector_store %arg5[%c0_32, %c0_33], %54 {strides = array<i32>} : memref<8x128xbf16, #tpu.memory_space<vmem>>, vector<8x128xbf16>,
    return
  }
  func.func @transform_0(%arg0: i32) -> (i32, i32) {
    %c0_i32 = arith.constant 0 : i32
    %c0_i32_0 = arith.constant 0 : i32
    return %arg0, %c0_i32 : i32, i32
  }
  func.func @transform_1(%arg0: i32) -> (i32, i32) {
    %c0_i32 = arith.constant 0 : i32
    %c0_i32_0 = arith.constant 0 : i32
    %c0_i32_1 = arith.constant 0 : i32
    return %c0_i32, %c0_i32_0 : i32, i32
  }
  func.func @transform_2(%arg0: i32) -> (i32, i32, i32) {
    %c0_i32 = arith.constant 0 : i32
    %c0_i32_0 = arith.constant 0 : i32
    %c0_i32_1 = arith.constant 0 : i32
    %c0_i32_2 = arith.constant 0 : i32
    return %c0_i32, %c0_i32_0, %c0_i32_1 : i32, i32, i32
  }
  func.func @transform_3(%arg0: i32) -> (i32, i32) {
    %c0_i32 = arith.constant 0 : i32
    %c0_i32_0 = arith.constant 0 : i32
    %c0_i32_1 = arith.constant 0 : i32
    return %c0_i32, %c0_i32_0 : i32, i32
  }
  func.func @transform_4(%arg0: i32) -> (i32, i32) {
    %c0_i32 = arith.constant 0 : i32
    %c0_i32_0 = arith.constant 0 : i32
    return %arg0, %c0_i32 : i32, i32
  }
}

</mosaic_0001>

<bundles_post_ra>
// kernel: hybrid_model_forward.1
= control target key start
LH: loop header
LB: loop body
LE: loop exit
PB: predicated region body
PF: predicated region fallthrough
CT: control target
= control target key end

     0   :  { %s3723_s15 = smov 0   ;;  %s4501_s0 = inlined_call_operand.vmem [shape: f32[16,3072], index: 0, kind: input, shape index: {}]   ;;  %s4502_s1 = inlined_call_operand.vmem [shape: bf16[3072,128], index: 1, kind: input, shape index: {}]   ;;  %s4503_s2 = inlined_call_operand.vmem [shape: bf16[4,128,128], index: 2, kind: input, shape index: {}]   ;;  %s4504_s3 = inlined_call_operand.vmem [shape: f32[5,128], index: 3, kind: input, shape index: {}]   ;;  %s4505_s4 = inlined_call_operand.vmem [shape: bf16[16,128], index: 4, kind: output, shape index: {}]  }
   0x1 LB: > { %s2783_s16 = sadd.s32 4294967295, %s3694_s15   ;;  %p2787_p0 = scmp.ge.s32.totalorder %s3694_s15, 1  ;;  %s3694_s15 = sphi %s3723_s15, %s14_s15  }
   0x2   : > { %p162_p1 = scmp.lt.s32.totalorder %s3694_s15, 3 }
   0x4   : > { %p163_p2 = pnand %p2787_p0, %p162_p1 }
   0x5   : > { %p187_p3 = scmp.lt.s32.totalorder (!%p163_p2), %s2783_s16, 1 }
   0x6   : > { %166 = sbr.rel (%p163_p2) target bundleno = 1384 (0x568), region = 36 }
   0xb   : > { %v3460_v0 = vld [vmem:[%s4502_s1 + $0x78] sm:$0xff]   ;;  %v3464_v4 = vld [vmem:[%s4502_s1 + $0x70] sm:$0xff]   ;;  %v3468_v8 = vld [vmem:[%s4502_s1 + $0x68] sm:$0xff]   ;;  %s4507_s16 = smov (!%p187_p3, %s2783_s16), 1  ;;  %vm3697_vm0 = vmmov 0  }
   0xc   : > { %v3461_v1 = vld [vmem:[%s4502_s1 + $0xf8] sm:$0xff]   ;;  %3069 = vmatprep.subr.bf16.mxu0 %v3460_v0  ;;  %v3465_v5 = vld [vmem:[%s4502_s1 + $0xf0] sm:$0xff]   ;;  %v3469_v9 = vld [vmem:[%s4502_s1 + $0xe8] sm:$0xff]   ;;  %s3449_s21 = smul.u32 192, %s4507_s16 }
   0xd   : > { %v3462_v2 = vld [vmem:[%s4502_s1 + $0x38] sm:$0xff]   ;;  %3091 = vmatprep.subr.bf16.mxu1 %v3461_v1  ;;  %v3466_v6 = vld [vmem:[%s4502_s1 + $0x30] sm:$0xff]   ;;  %v3470_v10 = vld [vmem:[%s4502_s1 + $0x28] sm:$0xff]  }
   0xe   : > { %v3463_v3 = vld [vmem:[%s4502_s1 + $0xb8] sm:$0xff]   ;;  %3070 = vmatpush3.bf16.msra.mxu0 %v3462_v2  ;;  %v3467_v7 = vld [vmem:[%s4502_s1 + $0xb0] sm:$0xff]   ;;  %v3471_v11 = vld [vmem:[%s4502_s1 + $0xa8] sm:$0xff]   ;;  %s3831_s6 = scalar_lea.vmem %s4501_s0, %s3449_s21 }
   0xf   : > { %3092 = vmatpush3.bf16.msra.mxu1 %v3463_v3  ;;  %3071 = vmatprep.subr.bf16.mxu0 %v3464_v4  ;;  %v3472_v12 = vld [vmem:[%s4502_s1 + $0x60] sm:$0xff]   ;;  %v3476_v16 = vld [vmem:[%s4502_s1 + $0x58] sm:$0xff]   ;;  %v3480_v20 = vld [vmem:[%s4502_s1 + $0x50] sm:$0xff]  }
  0x10   : > { %3093 = vmatprep.subr.bf16.mxu1 %v3465_v5  ;;  %v3473_v13 = vld [vmem:[%s4502_s1 + $0xe0] sm:$0xff]   ;;  %v3477_v17 = vld [vmem:[%s4502_s1 + $0xd8] sm:$0xff]   ;;  %v3481_v21 = vld [vmem:[%s4502_s1 + $0xd0] sm:$0xff]  }
  0x11   : > { %v3474_v14 = vld [vmem:[%s4502_s1 + $0x20] sm:$0xff]   ;;  %v3478_v18 = vld [vmem:[%s4502_s1 + $0x18] sm:$0xff]   ;;  %v3482_v22 = vld [vmem:[%s4502_s1 + $0x10] sm:$0xff]  }
  0x12   : > { %3072 = vmatpush3.bf16.msra.mxu0 %v3466_v6  ;;  %v3475_v15 = vld [vmem:[%s4502_s1 + $0xa0] sm:$0xff]   ;;  %v3479_v19 = vld [vmem:[%s4502_s1 + $0x98] sm:$0xff]   ;;  %v3483_v23 = vld [vmem:[%s4502_s1 + $0x90] sm:$0xff]  }
  0x13   : > { %3094 = vmatpush3.bf16.msra.mxu1 %v3467_v7  ;;  %3073 = vmatprep.subr.bf16.mxu0 %v3468_v8  ;;  %v3484_v24 = vld [vmem:[%s4502_s1 + $0x48] sm:$0xff]   ;;  %v3488_v28 = vld [vmem:[%s4502_s1 + $0x40] sm:$0xff]   ;;  %v200_v33 = vld [vmem:[%s3831_s6 + $0x18] sm:$0xff] }
  0x14   : > { %3095 = vmatprep.subr.bf16.mxu1 %v3469_v9  ;;  %v3485_v25 = vld [vmem:[%s4502_s1 + $0xc8] sm:$0xff]   ;;  %v3489_v29 = vld [vmem:[%s4502_s1 + $0xc0] sm:$0xff]   ;;  %v224_v36 = vpack.c.bf16 %v200_v33, %v200_v33  ;;  %v199_v38 = vld [vmem:[%s3831_s6 + $0x10] sm:$0xff] }
  0x15   : > { %v3486_v26 = vld [vmem:[%s4502_s1 + $0x8] sm:$0xff]   ;;  %v3490_v30 = vld [vmem:[%s4502_s1] sm:$0xff]   ;;  %v223_v39 = vpack.c.bf16 %v199_v38, %v199_v38  ;;  %v3492_v40 = vld [vmem:[%s4502_s1 + $0x178] sm:$0xff]  }
  0x16   : > { %3074 = vmatpush3.bf16.msra.mxu0 %v3470_v10  ;;  %v3487_v27 = vld [vmem:[%s4502_s1 + $0x88] sm:$0xff]   ;;  %v3491_v31 = vld [vmem:[%s4502_s1 + $0x80] sm:$0xff]   ;;  %1858 = vmatprep.mubr.bf16.mxu1 %v224_v36  ;;  %v3493_v41 = vld [vmem:[%s4502_s1 + $0x1f8] sm:$0xff]  }
  0x17   : > { %3096 = vmatpush3.bf16.msra.mxu1 %v3471_v11  ;;  %3075 = vmatprep.subr.bf16.mxu0 %v3472_v12  ;;  %v198_v32 = vld [vmem:[%s3831_s6 + $0x8] sm:$0xff]  ;;  %v197_v34 = vld [vmem:[%s3831_s6] sm:$0xff]  ;;  %v3494_v42 = vld [vmem:[%s4502_s1 + $0x138] sm:$0xff]  }
  0x18   : > { %3097 = vmatprep.subr.bf16.mxu1 %v3473_v13  ;;  %v222_v35 = vpack.c.bf16 %v198_v32, %v198_v32  ;;  %v221_v37 = vpack.c.bf16 %v197_v34, %v197_v34  ;;  %v3495_v43 = vld [vmem:[%s4502_s1 + $0x1b8] sm:$0xff]   ;;  %v3496_v44 = vld [vmem:[%s4502_s1 + $0x170] sm:$0xff]   ;;  %v3500_v48 = vld [vmem:[%s4502_s1 + $0x168] sm:$0xff]  }
  0x19   : > { %v3497_v45 = vld [vmem:[%s4502_s1 + $0x1f0] sm:$0xff]   ;;  %v3501_v49 = vld [vmem:[%s4502_s1 + $0x1e8] sm:$0xff]   ;;  %v3504_v52 = vld [vmem:[%s4502_s1 + $0x160] sm:$0xff]  }
  0x1a   : > { %3076 = vmatpush3.bf16.msra.mxu0 %v3474_v14  ;;  %1818 = vmatprep.mubr.bf16.mxu0 %v222_v35  ;;  %v3498_v46 = vld [vmem:[%s4502_s1 + $0x130] sm:$0xff]   ;;  %v3502_v50 = vld [vmem:[%s4502_s1 + $0x128] sm:$0xff]   ;;  %v3505_v53 = vld [vmem:[%s4502_s1 + $0x1e0] sm:$0xff]  }
  0x1b   : > { %3098 = vmatpush3.bf16.msra.mxu1 %v3475_v15  ;;  %3077 = vmatprep.subr.bf16.mxu0 %v3476_v16  ;;  %v3499_v47 = vld [vmem:[%s4502_s1 + $0x1b0] sm:$0xff]   ;;  %v3503_v51 = vld [vmem:[%s4502_s1 + $0x1a8] sm:$0xff]   ;;  %v3506_v54 = vld [vmem:[%s4502_s1 + $0x120] sm:$0xff]  }
  0x1c   : > { %3099 = vmatprep.subr.bf16.mxu1 %v3477_v17  ;;  %v3507_v55 = vld [vmem:[%s4502_s1 + $0x1a0] sm:$0xff]   ;;  %v3508_v56 = vld [vmem:[%s4502_s1 + $0x158] sm:$0xff]   ;;  %v3512_v60 = vld [vmem:[%s4502_s1 + $0x150] sm:$0xff]  }
  0x1d   : > { %v3509_v57 = vld [vmem:[%s4502_s1 + $0x1d8] sm:$0xff]   ;;  %v3513_v61 = vld [vmem:[%s4502_s1 + $0x1d0] sm:$0xff]   ;;  %v3516_v0 = vld [vmem:[%s4502_s1 + $0x148] sm:$0xff]  }
  0x1e   : > { %3078 = vmatpush3.bf16.msra.mxu0 %v3478_v18  ;;  %v3510_v58 = vld [vmem:[%s4502_s1 + $0x118] sm:$0xff]   ;;  %v3514_v62 = vld [vmem:[%s4502_s1 + $0x110] sm:$0xff]   ;;  %v3517_v1 = vld [vmem:[%s4502_s1 + $0x1c8] sm:$0xff]  }
  0x1f   : > { %3100 = vmatpush3.bf16.msra.mxu1 %v3479_v19  ;;  %3079 = vmatprep.subr.bf16.mxu0 %v3480_v20  ;;  %v3511_v59 = vld [vmem:[%s4502_s1 + $0x198] sm:$0xff]   ;;  %v3515_v63 = vld [vmem:[%s4502_s1 + $0x190] sm:$0xff]   ;;  %v3518_v2 = vld [vmem:[%s4502_s1 + $0x108] sm:$0xff]  }
  0x20   : > { %3101 = vmatprep.subr.bf16.mxu1 %v3481_v21  ;;  %v3519_v3 = vld [vmem:[%s4502_s1 + $0x188] sm:$0xff]   ;;  %v3520_v4 = vld [vmem:[%s4502_s1 + $0x140] sm:$0xff]   ;;  %v204_v9 = vld [vmem:[%s3831_s6 + $0x38] sm:$0xff] }
  0x21   : > { %v3521_v5 = vld [vmem:[%s4502_s1 + $0x1c0] sm:$0xff]   ;;  %v202_v8 = vld [vmem:[%s3831_s6 + $0x28] sm:$0xff]  ;;  %v228_v11 = vpack.c.bf16 %v204_v9, %v204_v9  ;;  %v203_v13 = vld [vmem:[%s3831_s6 + $0x30] sm:$0xff] }
  0x22   : > { %3080 = vmatpush3.bf16.msra.mxu0 %v3482_v22  ;;  %v3522_v6 = vld [vmem:[%s4502_s1 + $0x100] sm:$0xff]   ;;  %v226_v10 = vpack.c.bf16 %v202_v8, %v202_v8  ;;  %v227_v15 = vpack.c.bf16 %v203_v13, %v203_v13  ;;  %v3524_v16 = vld [vmem:[%s4502_s1 + $0x278] sm:$0xff]   ;;  %v3528_v20 = vld [vmem:[%s4502_s1 + $0x270] sm:$0xff]  }
  0x23   : > { %3102 = vmatpush3.bf16.msra.mxu1 %v3483_v23  ;;  %3081 = vmatprep.subr.bf16.mxu0 %v3484_v24  ;;  %v3523_v7 = vld [vmem:[%s4502_s1 + $0x180] sm:$0xff]   ;;  %v3525_v17 = vld [vmem:[%s4502_s1 + $0x2f8] sm:$0xff]   ;;  %v3529_v21 = vld [vmem:[%s4502_s1 + $0x2f0] sm:$0xff]  }
  0x24   : > { %3103 = vmatprep.subr.bf16.mxu1 %v3485_v25  ;;  %v201_v12 = vld [vmem:[%s3831_s6 + $0x20] sm:$0xff]  ;;  %v3526_v18 = vld [vmem:[%s4502_s1 + $0x238] sm:$0xff]   ;;  %v3530_v22 = vld [vmem:[%s4502_s1 + $0x230] sm:$0xff]  }
  0x25   : > { %v225_v14 = vpack.c.bf16 %v201_v12, %v201_v12  ;;  %v3527_v19 = vld [vmem:[%s4502_s1 + $0x2b8] sm:$0xff]   ;;  %v3531_v23 = vld [vmem:[%s4502_s1 + $0x2b0] sm:$0xff]   ;;  %v3532_v24 = vld [vmem:[%s4502_s1 + $0x268] sm:$0xff]  }
  0x26   : > { %3082 = vmatpush3.bf16.msra.mxu0 %v3486_v26  ;;  %v3533_v25 = vld [vmem:[%s4502_s1 + $0x2e8] sm:$0xff]   ;;  %v3540_v32 = vld [vmem:[%s4502_s1 + $0x258] sm:$0xff]   ;;  %v3544_v36 = vld [vmem:[%s4502_s1 + $0x250] sm:$0xff]  }
  0x27   : > { %3104 = vmatpush3.bf16.msra.mxu1 %v3487_v27  ;;  %3083 = vmatprep.subr.bf16.mxu0 %v3488_v28  ;;  %v3534_v26 = vld [vmem:[%s4502_s1 + $0x228] sm:$0xff]   ;;  %v3536_v28 = vld [vmem:[%s4502_s1 + $0x260] sm:$0xff]   ;;  %v3541_v33 = vld [vmem:[%s4502_s1 + $0x2d8] sm:$0xff]  }
  0x28   : > { %3105 = vmatprep.subr.bf16.mxu1 %v3489_v29  ;;  %v3535_v27 = vld [vmem:[%s4502_s1 + $0x2a8] sm:$0xff]   ;;  %v3537_v29 = vld [vmem:[%s4502_s1 + $0x2e0] sm:$0xff]   ;;  %v3542_v34 = vld [vmem:[%s4502_s1 + $0x218] sm:$0xff]  }
  0x29   : > { %v3543_v35 = vld [vmem:[%s4502_s1 + $0x298] sm:$0xff]   ;;  %v3546_v38 = vld [vmem:[%s4502_s1 + $0x210] sm:$0xff]  }
  0x2a   : > { %3084 = vmatpush3.bf16.msra.mxu0 %v3490_v30  ;;  %v3538_v30 = vld [vmem:[%s4502_s1 + $0x220] sm:$0xff]   ;;  %v3572_v8 = vld [vmem:[%s4502_s1 + $0x358] sm:$0xff]   ;;  %v3576_v12 = vld [vmem:[%s4502_s1 + $0x350] sm:$0xff]  }
  0x2b   : > { %3106 = vmatpush3.bf16.msra.mxu1 %v3491_v31  ;;  %3113 = vmatprep.subr.bf16.mxu0 %v3492_v40  ;;  %v3539_v31 = vld [vmem:[%s4502_s1 + $0x2a0] sm:$0xff]   ;;  %v3548_v40 = vld [vmem:[%s4502_s1 + $0x248] sm:$0xff]   ;;  %v3573_v9 = vld [vmem:[%s4502_s1 + $0x3d8] sm:$0xff]  }
  0x2c   : > { %3135 = vmatprep.subr.bf16.mxu1 %v3493_v41  ;;  %v3549_v41 = vld [vmem:[%s4502_s1 + $0x2c8] sm:$0xff]   ;;  %v3577_v13 = vld [vmem:[%s4502_s1 + $0x3d0] sm:$0xff]  }
  0x2d   : > { %1819 = vmatmul.mubr.bf16.vlgmr.msra.gmra.mxu0 %v221_v37  ;;  %v3545_v37 = vld [vmem:[%s4502_s1 + $0x2d0] sm:$0xff]  }
  0x2e   : > { %1859 = vmatmul.mubr.bf16.vlgmr.msra.gmra.mxu1 %v223_v39  ;;  %3114 = vmatpush3.bf16.msra.mxu0 %v3494_v42  ;;  %v3547_v39 = vld [vmem:[%s4502_s1 + $0x290] sm:$0xff]   ;;  %v3550_v42 = vld [vmem:[%s4502_s1 + $0x208] sm:$0xff]  }
  0x2f   : > { %3136 = vmatpush3.bf16.msra.mxu1 %v3495_v43  ;;  %3115 = vmatprep.subr.bf16.mxu0 %v3496_v44  ;;  %v3551_v43 = vld [vmem:[%s4502_s1 + $0x288] sm:$0xff]   ;;  %v3552_v44 = vld [vmem:[%s4502_s1 + $0x240] sm:$0xff]  }
  0x30   : > { %3137 = vmatprep.subr.bf16.mxu1 %v3497_v45  ;;  %1898 = vmatprep.mubr.bf16.mxu0 %v226_v10  ;;  %v3553_v45 = vld [vmem:[%s4502_s1 + $0x2c0] sm:$0xff]   ;;  %v3574_v10 = vld [vmem:[%s4502_s1 + $0x318] sm:$0xff]  }
  0x31   : > { %1938 = vmatprep.mubr.bf16.mxu1 %v228_v11  ;;  %v3575_v11 = vld [vmem:[%s4502_s1 + $0x398] sm:$0xff]  }
  0x32   : > { %3116 = vmatpush3.bf16.msra.mxu0 %v3498_v46  ;;  %v3554_v46 = vld [vmem:[%s4502_s1 + $0x200] sm:$0xff]  }
  0x33   : > { %3138 = vmatpush3.bf16.msra.mxu1 %v3499_v47  ;;  %3117 = vmatprep.subr.bf16.mxu0 %v3500_v48  ;;  %v3555_v47 = vld [vmem:[%s4502_s1 + $0x280] sm:$0xff]   ;;  %v206_v48 = vld [vmem:[%s3831_s6 + $0x48] sm:$0xff] }
  0x34   : > { %3139 = vmatprep.subr.bf16.mxu1 %v3501_v49  ;;  %v230_v49 = vpack.c.bf16 %v206_v48, %v206_v48  ;;  %v3604_v48 = vld [vmem:[%s4502_s1 + $0x458] sm:$0xff]  }
  0x36   : > { %3118 = vmatpush3.bf16.msra.mxu0 %v3502_v50  ;;  %v208_v50 = vld [vmem:[%s3831_s6 + $0x58] sm:$0xff] }
  0x37   : > { %3140 = vmatpush3.bf16.msra.mxu1 %v3503_v51  ;;  %3119 = vmatprep.subr.bf16.mxu0 %v3504_v52  ;;  %v205_v51 = vld [vmem:[%s3831_s6 + $0x40] sm:$0xff]  ;;  %v207_v52 = vld [vmem:[%s3831_s6 + $0x50] sm:$0xff] }
  0x38   : > { %3141 = vmatprep.subr.bf16.mxu1 %v3505_v53  ;;  %v232_v53 = vpack.c.bf16 %v208_v50, %v208_v50  ;;  %v3606_v50 = vld [vmem:[%s4502_s1 + $0x418] sm:$0xff]  }
  0x3a   : > { %3120 = vmatpush3.bf16.msra.mxu0 %v3506_v54  ;;  %v229_v54 = vpack.c.bf16 %v205_v51, %v205_v51  ;;  %v3607_v51 = vld [vmem:[%s4502_s1 + $0x498] sm:$0xff]  }
  0x3b   : > { %3142 = vmatpush3.bf16.msra.mxu1 %v3507_v55  ;;  %3121 = vmatprep.subr.bf16.mxu0 %v3508_v56  ;;  %v231_v55 = vpack.c.bf16 %v207_v52, %v207_v52  ;;  %v3556_v56 = vld [vmem:[%s4502_s1 + $0x378] sm:$0xff]   ;;  %v3608_v52 = vld [vmem:[%s4502_s1 + $0x450] sm:$0xff]  }
  0x3c   : > { %3143 = vmatprep.subr.bf16.mxu1 %v3509_v57  ;;  %v3557_v57 = vld [vmem:[%s4502_s1 + $0x3f8] sm:$0xff]  }
  0x3e   : > { %3122 = vmatpush3.bf16.msra.mxu0 %v3510_v58  ;;  %v3558_v58 = vld [vmem:[%s4502_s1 + $0x338] sm:$0xff]  }
  0x3f   : > { %3144 = vmatpush3.bf16.msra.mxu1 %v3511_v59  ;;  %3123 = vmatprep.subr.bf16.mxu0 %v3512_v60  ;;  %v3559_v59 = vld [vmem:[%s4502_s1 + $0x3b8] sm:$0xff]   ;;  %v3560_v60 = vld [vmem:[%s4502_s1 + $0x370] sm:$0xff]  }
  0x40   : > { %3145 = vmatprep.subr.bf16.mxu1 %v3513_v61  ;;  %v3561_v61 = vld [vmem:[%s4502_s1 + $0x3f0] sm:$0xff]  }
  0x42   : > { %3124 = vmatpush3.bf16.msra.mxu0 %v3514_v62  ;;  %v3562_v62 = vld [vmem:[%s4502_s1 + $0x330] sm:$0xff]  }
  0x43   : > { %3146 = vmatpush3.bf16.msra.mxu1 %v3515_v63  ;;  %3125 = vmatprep.subr.bf16.mxu0 %v3516_v0  ;;  %v3563_v63 = vld [vmem:[%s4502_s1 + $0x3b0] sm:$0xff]   ;;  %v3564_v0 = vld [vmem:[%s4502_s1 + $0x368] sm:$0xff]  }
  0x44   : > { %3147 = vmatprep.subr.bf16.mxu1 %v3517_v1  ;;  %v3565_v1 = vld [vmem:[%s4502_s1 + $0x3e8] sm:$0xff]  }
  0x46   : > { %3126 = vmatpush3.bf16.msra.mxu0 %v3518_v2  ;;  %v3566_v2 = vld [vmem:[%s4502_s1 + $0x328] sm:$0xff]  }
  0x47   : > { %3148 = vmatpush3.bf16.msra.mxu1 %v3519_v3  ;;  %3127 = vmatprep.subr.bf16.mxu0 %v3520_v4  ;;  %v3567_v3 = vld [vmem:[%s4502_s1 + $0x3a8] sm:$0xff]   ;;  %v3568_v4 = vld [vmem:[%s4502_s1 + $0x360] sm:$0xff]  }
  0x48   : > { %3149 = vmatprep.subr.bf16.mxu1 %v3521_v5  ;;  %v3569_v5 = vld [vmem:[%s4502_s1 + $0x3e0] sm:$0xff]  }
  0x4a   : > { %3128 = vmatpush3.bf16.msra.mxu0 %v3522_v6  ;;  %v3570_v6 = vld [vmem:[%s4502_s1 + $0x320] sm:$0xff]  }
  0x4b   : > { %3150 = vmatpush3.bf16.msra.mxu1 %v3523_v7  ;;  %3157 = vmatprep.subr.bf16.mxu0 %v3524_v16  ;;  %v3571_v7 = vld [vmem:[%s4502_s1 + $0x3a0] sm:$0xff]   ;;  %v3580_v16 = vld [vmem:[%s4502_s1 + $0x348] sm:$0xff]  }
  0x4c   : > { %3179 = vmatprep.subr.bf16.mxu1 %v3525_v17  ;;  %v3581_v17 = vld [vmem:[%s4502_s1 + $0x3c8] sm:$0xff]  }
  0x4d   : > { %1899 = vmatmul.mubr.bf16.vlgmr.msra.gmra.mxu0 %v225_v14  ;;  %v3578_v14 = vld [vmem:[%s4502_s1 + $0x310] sm:$0xff]  }
  0x4e   : > { %1939 = vmatmul.mubr.bf16.vlgmr.msra.gmra.mxu1 %v227_v15  ;;  %3158 = vmatpush3.bf16.msra.mxu0 %v3526_v18  ;;  %v3579_v15 = vld [vmem:[%s4502_s1 + $0x390] sm:$0xff]   ;;  %v3582_v18 = vld [vmem:[%s4502_s1 + $0x308] sm:$0xff]  }
  0x4f   : > { %3180 = vmatpush3.bf16.msra.mxu1 %v3527_v19  ;;  %3159 = vmatprep.subr.bf16.mxu0 %v3528_v20  ;;  %v3583_v19 = vld [vmem:[%s4502_s1 + $0x388] sm:$0xff]   ;;  %v3584_v20 = vld [vmem:[%s4502_s1 + $0x340] sm:$0xff]  }
  0x50   : > { %3181 = vmatprep.subr.bf16.mxu1 %v3529_v21  ;;  %1978 = vmatprep.mubr.bf16.mxu0 %v230_v49  ;;  %v3585_v21 = vld [vmem:[%s4502_s1 + $0x3c0] sm:$0xff]   ;;  %v3605_v49 = vld [vmem:[%s4502_s1 + $0x4d8] sm:$0xff]  }
  0x51   : > { %2018 = vmatprep.mubr.bf16.mxu1 %v232_v53  ;;  %v3609_v53 = vld [vmem:[%s4502_s1 + $0x4d0] sm:$0xff]  }
  0x52   : > { %3160 = vmatpush3.bf16.msra.mxu0 %v3530_v22  ;;  %v3586_v22 = vld [vmem:[%s4502_s1 + $0x300] sm:$0xff]  }
  0x53   : > { %3182 = vmatpush3.bf16.msra.mxu1 %v3531_v23  ;;  %3161 = vmatprep.subr.bf16.mxu0 %v3532_v24  ;;  %v3587_v23 = vld [vmem:[%s4502_s1 + $0x380] sm:$0xff]   ;;  %v210_v24 = vld [vmem:[%s3831_s6 + $0x68] sm:$0xff] }
  0x54   : > { %3183 = vmatprep.subr.bf16.mxu1 %v3533_v25  ;;  %v212_v25 = vld [vmem:[%s3831_s6 + $0x78] sm:$0xff] }
  0x56   : > { %3162 = vmatpush3.bf16.msra.mxu0 %v3534_v26  ;;  %v209_v26 = vld [vmem:[%s3831_s6 + $0x60] sm:$0xff] }
  0x57   : > { %3184 = vmatpush3.bf16.msra.mxu1 %v3535_v27  ;;  %3163 = vmatprep.subr.bf16.mxu0 %v3536_v28  ;;  %v234_v27 = vpack.c.bf16 %v210_v24, %v210_v24  ;;  %v236_v28 = vpack.c.bf16 %v212_v25, %v212_v25  ;;  %v3636_v24 = vld [vmem:[%s4502_s1 + $0x558] sm:$0xff]  }
  0x58   : > { %3185 = vmatprep.subr.bf16.mxu1 %v3537_v29  ;;  %v233_v29 = vpack.c.bf16 %v209_v26, %v209_v26  ;;  %v3637_v25 = vld [vmem:[%s4502_s1 + $0x5d8] sm:$0xff]  }
  0x59   : > { %v3638_v26 = vld [vmem:[%s4502_s1 + $0x518] sm:$0xff]  }
  0x5a   : > { %3164 = vmatpush3.bf16.msra.mxu0 %v3538_v30  ;;  %v211_v30 = vld [vmem:[%s3831_s6 + $0x70] sm:$0xff] }
  0x5b   : > { %3186 = vmatpush3.bf16.msra.mxu1 %v3539_v31  ;;  %3165 = vmatprep.subr.bf16.mxu0 %v3540_v32  ;;  %v235_v31 = vpack.c.bf16 %v211_v30, %v211_v30  ;;  %v3588_v32 = vld [vmem:[%s4502_s1 + $0x478] sm:$0xff]   ;;  %v3642_v30 = vld [vmem:[%s4502_s1 + $0x510] sm:$0xff]  }
  0x5c   : > { %3187 = vmatprep.subr.bf16.mxu1 %v3541_v33  ;;  %v3589_v33 = vld [vmem:[%s4502_s1 + $0x4f8] sm:$0xff]  }
  0x5e   : > { %3166 = vmatpush3.bf16.msra.mxu0 %v3542_v34  ;;  %v3590_v34 = vld [vmem:[%s4502_s1 + $0x438] sm:$0xff]  }
  0x5f   : > { %3188 = vmatpush3.bf16.msra.mxu1 %v3543_v35  ;;  %3167 = vmatprep.subr.bf16.mxu0 %v3544_v36  ;;  %v3591_v35 = vld [vmem:[%s4502_s1 + $0x4b8] sm:$0xff]   ;;  %v3592_v36 = vld [vmem:[%s4502_s1 + $0x470] sm:$0xff]  }
  0x60   : > { %3189 = vmatprep.subr.bf16.mxu1 %v3545_v37  ;;  %v3593_v37 = vld [vmem:[%s4502_s1 + $0x4f0] sm:$0xff]  }
  0x62   : > { %3168 = vmatpush3.bf16.msra.mxu0 %v3546_v38  ;;  %v3594_v38 = vld [vmem:[%s4502_s1 + $0x430] sm:$0xff]  }
  0x63   : > { %3190 = vmatpush3.bf16.msra.mxu1 %v3547_v39  ;;  %3169 = vmatprep.subr.bf16.mxu0 %v3548_v40  ;;  %v3595_v39 = vld [vmem:[%s4502_s1 + $0x4b0] sm:$0xff]   ;;  %v3596_v40 = vld [vmem:[%s4502_s1 + $0x468] sm:$0xff]  }
  0x64   : > { %3191 = vmatprep.subr.bf16.mxu1 %v3549_v41  ;;  %v3597_v41 = vld [vmem:[%s4502_s1 + $0x4e8] sm:$0xff]  }
  0x66   : > { %3170 = vmatpush3.bf16.msra.mxu0 %v3550_v42  ;;  %v3598_v42 = vld [vmem:[%s4502_s1 + $0x428] sm:$0xff]  }
  0x67   : > { %3192 = vmatpush3.bf16.msra.mxu1 %v3551_v43  ;;  %3171 = vmatprep.subr.bf16.mxu0 %v3552_v44  ;;  %v3599_v43 = vld [vmem:[%s4502_s1 + $0x4a8] sm:$0xff]   ;;  %v3600_v44 = vld [vmem:[%s4502_s1 + $0x460] sm:$0xff]  }
  0x68   : > { %3193 = vmatprep.subr.bf16.mxu1 %v3553_v45  ;;  %v3601_v45 = vld [vmem:[%s4502_s1 + $0x4e0] sm:$0xff]  }
  0x6a   : > { %3172 = vmatpush3.bf16.msra.mxu0 %v3554_v46  ;;  %v3602_v46 = vld [vmem:[%s4502_s1 + $0x420] sm:$0xff]  }
  0x6b   : > { %3194 = vmatpush3.bf16.msra.mxu1 %v3555_v47  ;;  %3201 = vmatprep.subr.bf16.mxu0 %v3556_v56  ;;  %v3603_v47 = vld [vmem:[%s4502_s1 + $0x4a0] sm:$0xff]   ;;  %v3612_v56 = vld [vmem:[%s4502_s1 + $0x448] sm:$0xff]  }
  0x6c   : > { %3223 = vmatprep.subr.bf16.mxu1 %v3557_v57  ;;  %v3613_v57 = vld [vmem:[%s4502_s1 + $0x4c8] sm:$0xff]  }
  0x6d   : > { %1979 = vmatmul.mubr.bf16.vlgmr.msra.gmra.mxu0 %v229_v54  ;;  %v3610_v54 = vld [vmem:[%s4502_s1 + $0x410] sm:$0xff]  }
  0x6e   : > { %2019 = vmatmul.mubr.bf16.vlgmr.msra.gmra.mxu1 %v231_v55  ;;  %3202 = vmatpush3.bf16.msra.mxu0 %v3558_v58  ;;  %v3611_v55 = vld [vmem:[%s4502_s1 + $0x490] sm:$0xff]   ;;  %v3614_v58 = vld [vmem:[%s4502_s1 + $0x408] sm:$0xff]  }
  0x6f   : > { %3224 = vmatpush3.bf16.msra.mxu1 %v3559_v59  ;;  %3203 = vmatprep.subr.bf16.mxu0 %v3560_v60  ;;  %v3615_v59 = vld [vmem:[%s4502_s1 + $0x488] sm:$0xff]   ;;  %v3616_v60 = vld [vmem:[%s4502_s1 + $0x440] sm:$0xff]  }
  0x70   : > { %3225 = vmatprep.subr.bf16.mxu1 %v3561_v61  ;;  %2058 = vmatprep.mubr.bf16.mxu0 %v234_v27  ;;  %v3617_v61 = vld [vmem:[%s4502_s1 + $0x4c0] sm:$0xff]   ;;  %v3639_v27 = vld [vmem:[%s4502_s1 + $0x598] sm:$0xff]  }
  0x71   : > { %2098 = vmatprep.mubr.bf16.mxu1 %v236_v28  ;;  %v3640_v28 = vld [vmem:[%s4502_s1 + $0x550] sm:$0xff]  }
  0x72   : > { %3204 = vmatpush3.bf16.msra.mxu0 %v3562_v62  ;;  %v3618_v62 = vld [vmem:[%s4502_s1 + $0x400] sm:$0xff]  }
  0x73   : > { %3226 = vmatpush3.bf16.msra.mxu1 %v3563_v63  ;;  %3205 = vmatprep.subr.bf16.mxu0 %v3564_v0  ;;  %v3619_v63 = vld [vmem:[%s4502_s1 + $0x480] sm:$0xff]   ;;  %v214_v0 = vld [vmem:[%s3831_s6 + $0x88] sm:$0xff] }
  0x74   : > { %3227 = vmatprep.subr.bf16.mxu1 %v3565_v1  ;;  %v216_v1 = vld [vmem:[%s3831_s6 + $0x98] sm:$0xff] }
  0x76   : > { %3206 = vmatpush3.bf16.msra.mxu0 %v3566_v2  ;;  %v238_v2 = vpack.c.bf16 %v214_v0, %v214_v0  ;;  %v3654_v0 = vld [vmem:[%s4503_s2 + $0x28] sm:$0xff]  }
  0x77   : > { %3228 = vmatpush3.bf16.msra.mxu1 %v3567_v3  ;;  %3207 = vmatprep.subr.bf16.mxu0 %v3568_v4  ;;  %v240_v3 = vpack.c.bf16 %v216_v1, %v216_v1  ;;  %v213_v4 = vld [vmem:[%s3831_s6 + $0x80] sm:$0xff] }
  0x78   : > { %3229 = vmatprep.subr.bf16.mxu1 %v3569_v5  ;;  %v215_v5 = vld [vmem:[%s3831_s6 + $0x90] sm:$0xff]  ;;  %v3655_v1 = vld [vmem:[%s4503_s2 + $0x20] sm:$0xff]  }
  0x7a   : > { %3208 = vmatpush3.bf16.msra.mxu0 %v3570_v6  ;;  %v237_v6 = vpack.c.bf16 %v213_v4, %v213_v4 }
  0x7b   : > { %3230 = vmatpush3.bf16.msra.mxu1 %v3571_v7  ;;  %3209 = vmatprep.subr.bf16.mxu0 %v3572_v8  ;;  %v239_v7 = vpack.c.bf16 %v215_v5, %v215_v5  ;;  %v3620_v8 = vld [vmem:[%s4502_s1 + $0x578] sm:$0xff]  }
  0x7c   : > { %3231 = vmatprep.subr.bf16.mxu1 %v3573_v9  ;;  %v3621_v9 = vld [vmem:[%s4502_s1 + $0x5f8] sm:$0xff]  }
  0x7e   : > { %3210 = vmatpush3.bf16.msra.mxu0 %v3574_v10  ;;  %v3622_v10 = vld [vmem:[%s4502_s1 + $0x538] sm:$0xff]  }
  0x7f   : > { %3232 = vmatpush3.bf16.msra.mxu1 %v3575_v11  ;;  %3211 = vmatprep.subr.bf16.mxu0 %v3576_v12  ;;  %v3623_v11 = vld [vmem:[%s4502_s1 + $0x5b8] sm:$0xff]   ;;  %v3624_v12 = vld [vmem:[%s4502_s1 + $0x570] sm:$0xff]  }
  0x80   : > { %3233 = vmatprep.subr.bf16.mxu1 %v3577_v13  ;;  %v3625_v13 = vld [vmem:[%s4502_s1 + $0x5f0] sm:$0xff]  }
  0x82   : > { %3212 = vmatpush3.bf16.msra.mxu0 %v3578_v14  ;;  %v3626_v14 = vld [vmem:[%s4502_s1 + $0x530] sm:$0xff]  }
  0x83   : > { %3234 = vmatpush3.bf16.msra.mxu1 %v3579_v15  ;;  %3213 = vmatprep.subr.bf16.mxu0 %v3580_v16  ;;  %v3627_v15 = vld [vmem:[%s4502_s1 + $0x5b0] sm:$0xff]   ;;  %v3628_v16 = vld [vmem:[%s4502_s1 + $0x568] sm:$0xff]  }
  0x84   : > { %3235 = vmatprep.subr.bf16.mxu1 %v3581_v17  ;;  %v3629_v17 = vld [vmem:[%s4502_s1 + $0x5e8] sm:$0xff]  }
  0x86   : > { %3214 = vmatpush3.bf16.msra.mxu0 %v3582_v18  ;;  %v3630_v18 = vld [vmem:[%s4502_s1 + $0x528] sm:$0xff]  }
  0x87   : > { %3236 = vmatpush3.bf16.msra.mxu1 %v3583_v19  ;;  %3215 = vmatprep.subr.bf16.mxu0 %v3584_v20  ;;  %v3631_v19 = vld [vmem:[%s4502_s1 + $0x5a8] sm:$0xff]   ;;  %v3632_v20 = vld [vmem:[%s4502_s1 + $0x560] sm:$0xff]  }
  0x88   : > { %3237 = vmatprep.subr.bf16.mxu1 %v3585_v21  ;;  %v3633_v21 = vld [vmem:[%s4502_s1 + $0x5e0] sm:$0xff]  }
  0x8a   : > { %3216 = vmatpush3.bf16.msra.mxu0 %v3586_v22  ;;  %v3634_v22 = vld [vmem:[%s4502_s1 + $0x520] sm:$0xff]  }
  0x8b   : > { %3238 = vmatpush3.bf16.msra.mxu1 %v3587_v23  ;;  %3245 = vmatprep.subr.bf16.mxu0 %v3588_v32  ;;  %v3635_v23 = vld [vmem:[%s4502_s1 + $0x5a0] sm:$0xff]   ;;  %v3644_v32 = vld [vmem:[%s4502_s1 + $0x548] sm:$0xff]  }
  0x8c   : > { %3267 = vmatprep.subr.bf16.mxu1 %v3589_v33  ;;  %v3645_v33 = vld [vmem:[%s4502_s1 + $0x5c8] sm:$0xff]  }
  0x8d   : > { %2059 = vmatmul.mubr.bf16.vlgmr.msra.gmra.mxu0 %v233_v29  ;;  %v3641_v29 = vld [vmem:[%s4502_s1 + $0x5d0] sm:$0xff]  }
  0x8e   : > { %2099 = vmatmul.mubr.bf16.vlgmr.msra.gmra.mxu1 %v235_v31  ;;  %3246 = vmatpush3.bf16.msra.mxu0 %v3590_v34  ;;  %v3643_v31 = vld [vmem:[%s4502_s1 + $0x590] sm:$0xff]   ;;  %v3646_v34 = vld [vmem:[%s4502_s1 + $0x508] sm:$0xff]  }
  0x8f   : > { %3268 = vmatpush3.bf16.msra.mxu1 %v3591_v35  ;;  %3247 = vmatprep.subr.bf16.mxu0 %v3592_v36  ;;  %v3647_v35 = vld [vmem:[%s4502_s1 + $0x588] sm:$0xff]   ;;  %v3648_v36 = vld [vmem:[%s4502_s1 + $0x540] sm:$0xff]  }
  0x90   : > { %3269 = vmatprep.subr.bf16.mxu1 %v3593_v37  ;;  %2138 = vmatprep.mubr.bf16.mxu0 %v238_v2  ;;  %v3649_v37 = vld [vmem:[%s4502_s1 + $0x5c0] sm:$0xff]   ;;  %v3656_v2 = vld [vmem:[%s4503_s2 + $0x18] sm:$0xff]  }
  0x91   : > { %2178 = vmatprep.mubr.bf16.mxu1 %v240_v3 }
  0x92   : > { %3248 = vmatpush3.bf16.msra.mxu0 %v3594_v38  ;;  %v3650_v38 = vld [vmem:[%s4502_s1 + $0x500] sm:$0xff]  }
  0x93   : > { %3270 = vmatpush3.bf16.msra.mxu1 %v3595_v39  ;;  %3249 = vmatprep.subr.bf16.mxu0 %v3596_v40  ;;  %v3651_v39 = vld [vmem:[%s4502_s1 + $0x580] sm:$0xff]   ;;  %v218_v40 = vld [vmem:[%s3831_s6 + $0xa8] sm:$0xff] }
  0x94   : > { %3271 = vmatprep.subr.bf16.mxu1 %v3597_v41  ;;  %v242_v41 = vpack.c.bf16 %v218_v40, %v218_v40 }
  0x96   : > { %3250 = vmatpush3.bf16.msra.mxu0 %v3598_v42  ;;  %v220_v42 = vld [vmem:[%s3831_s6 + $0xb8] sm:$0xff] }
  0x97   : > { %3272 = vmatpush3.bf16.msra.mxu1 %v3599_v43  ;;  %3251 = vmatprep.subr.bf16.mxu0 %v3600_v44  ;;  %v217_v43 = vld [vmem:[%s3831_s6 + $0xa0] sm:$0xff]  ;;  %v219_v44 = vld [vmem:[%s3831_s6 + $0xb0] sm:$0xff]  ;;  %s2789_s6 = sshll.u32 %s4507_s16, 2 }
  0x98   : > { %3273 = vmatprep.subr.bf16.mxu1 %v3601_v45  ;;  %v244_v45 = vpack.c.bf16 %v220_v42, %v220_v42  ;;  %s195_s13 = scalar_lea.vmem %s4505_s4, %s2789_s6 }
  0x9a   : > { %3252 = vmatpush3.bf16.msra.mxu0 %v3602_v46  ;;  %v241_v46 = vpack.c.bf16 %v217_v43, %v217_v43 }
  0x9b   : > { %3274 = vmatpush3.bf16.msra.mxu1 %v3603_v47  ;;  %3253 = vmatprep.subr.bf16.mxu0 %v3604_v48  ;;  %v243_v47 = vpack.c.bf16 %v219_v44, %v219_v44 }
  0x9c   : > { %3275 = vmatprep.subr.bf16.mxu1 %v3605_v49 }
  0x9e   : > { %3254 = vmatpush3.bf16.msra.mxu0 %v3606_v50  ;;  %v2790_v50 = vld [vmem:[%s4504_s3] ss:$0 sm:$0xff] }
  0x9f   : > { %3276 = vmatpush3.bf16.msra.mxu1 %v3607_v51  ;;  %3255 = vmatprep.subr.bf16.mxu0 %v3608_v52 }
  0xa0   : > { %3277 = vmatprep.subr.bf16.mxu1 %v3609_v53 }
  0xa2   : > { %3256 = vmatpush3.bf16.msra.mxu0 %v3610_v54 }
  0xa3   : > { %3278 = vmatpush3.bf16.msra.mxu1 %v3611_v55  ;;  %3257 = vmatprep.subr.bf16.mxu0 %v3612_v56 }
  0xa4   : > { %3279 = vmatprep.subr.bf16.mxu1 %v3613_v57 }
  0xa6   : > { %3258 = vmatpush3.bf16.msra.mxu0 %v3614_v58 }
  0xa7   : > { %3280 = vmatpush3.bf16.msra.mxu1 %v3615_v59  ;;  %3259 = vmatprep.subr.bf16.mxu0 %v3616_v60 }
  0xa8   : > { %3281 = vmatprep.subr.bf16.mxu1 %v3617_v61  ;;  %v3652_v61 = vld [vmem:[%s4503_s2 + $0x38] sm:$0xff]  }
  0xaa   : > { %3260 = vmatpush3.bf16.msra.mxu0 %v3618_v62  ;;  %v3696_v62 = vmov 0.0  }
  0xab   : > { %3282 = vmatpush3.bf16.msra.mxu1 %v3619_v63  ;;  %3289 = vmatprep.subr.bf16.mxu0 %v3620_v8  ;;  %v3653_v63 = vld [vmem:[%s4503_s2 + $0x30] sm:$0xff]  }
  0xac   : > { %3311 = vmatprep.subr.bf16.mxu1 %v3621_v9 }
  0xad   : > { %2139 = vmatmul.mubr.bf16.vlgmr.msra.gmra.mxu0 %v237_v6 }
  0xae   : > { %2179 = vmatmul.mubr.bf16.vlgmr.msra.gmra.mxu1 %v239_v7  ;;  %3290 = vmatpush3.bf16.msra.mxu0 %v3622_v10 }
  0xaf   : > { %3312 = vmatpush3.bf16.msra.mxu1 %v3623_v11  ;;  %3291 = vmatprep.subr.bf16.mxu0 %v3624_v12 }
  0xb0   : > { %3313 = vmatprep.subr.bf16.mxu1 %v3625_v13  ;;  %2218 = vmatprep.mubr.bf16.mxu0 %v242_v41  ;;  %v3657_v13 = vld [vmem:[%s4503_s2 + $0x10] sm:$0xff]  }
  0xb1   : > { %2258 = vmatprep.mubr.bf16.mxu1 %v244_v45 }
  0xb2   : > { %3292 = vmatpush3.bf16.msra.mxu0 %v3626_v14 }
  0xb3   : > { %3314 = vmatpush3.bf16.msra.mxu1 %v3627_v15  ;;  %3293 = vmatprep.subr.bf16.mxu0 %v3628_v16  ;;  %v3658_v16 = vld [vmem:[%s4503_s2 + $0x8] sm:$0xff]  }
  0xb4   : > { %3315 = vmatprep.subr.bf16.mxu1 %v3629_v17  ;;  %v3659_v17 = vld [vmem:[%s4503_s2] sm:$0xff]  }
  0xb6   : > { %3294 = vmatpush3.bf16.msra.mxu0 %v3630_v18 }
  0xb7   : > { %3316 = vmatpush3.bf16.msra.mxu1 %v3631_v19  ;;  %3295 = vmatprep.subr.bf16.mxu0 %v3632_v20 }
  0xb8   : > { %3317 = vmatprep.subr.bf16.mxu1 %v3633_v21 }
  0xba   : > { %3296 = vmatpush3.bf16.msra.mxu0 %v3634_v22 }
  0xbb   : > { %3318 = vmatpush3.bf16.msra.mxu1 %v3635_v23  ;;  %3297 = vmatprep.subr.bf16.mxu0 %v3636_v24 }
  0xbc   : > { %3319 = vmatprep.subr.bf16.mxu1 %v3637_v25 }
  0xbe   : > { %3298 = vmatpush3.bf16.msra.mxu0 %v3638_v26 }
  0xbf   : > { %3320 = vmatpush3.bf16.msra.mxu1 %v3639_v27  ;;  %3299 = vmatprep.subr.bf16.mxu0 %v3640_v28 }
  0xc0   : > { %3321 = vmatprep.subr.bf16.mxu1 %v3641_v29 }
  0xc2   : > { %3300 = vmatpush3.bf16.msra.mxu0 %v3642_v30 }
  0xc3   : > { %3322 = vmatpush3.bf16.msra.mxu1 %v3643_v31  ;;  %3301 = vmatprep.subr.bf16.mxu0 %v3644_v32 }
  0xc4   : > { %3323 = vmatprep.subr.bf16.mxu1 %v3645_v33 }
  0xc6   : > { %3302 = vmatpush3.bf16.msra.mxu0 %v3646_v34 }
  0xc7   : > { %3324 = vmatpush3.bf16.msra.mxu1 %v3647_v35  ;;  %3303 = vmatprep.subr.bf16.mxu0 %v3648_v36 }
  0xc8   : > { %3325 = vmatprep.subr.bf16.mxu1 %v3649_v37 }
  0xca   : > { %3304 = vmatpush3.bf16.msra.mxu0 %v3650_v38 }
  0xcb   : > { %3326 = vmatpush3.bf16.msra.mxu1 %v3651_v39  ;;  %3369 = vmatprep.subr.bf16.mxu0 %v3696_v62 }
  0xcc   : > { %3389 = vmatprep.subr.bf16.mxu1 %v3696_v62 }
  0xcd   : > { %2219 = vmatmul.mubr.bf16.vlgmr.msra.gmra.mxu0 %v241_v46 }
  0xce   : > { %2259 = vmatmul.mubr.bf16.vlgmr.msra.gmra.mxu1 %v243_v47  ;;  %3370 = vmatpush3.bf16.msra.mxu0 %v3652_v61 }
  0xcf   : > { %3371 = vmatprep.subr.bf16.mxu0 %v3696_v62  ;;  %3385 = vmatprep.mubr.msk.bf16.mxu0 %vm3697_vm0, %v3696_v62 }
  0xd0   : > { %3405 = vmatprep.mubr.msk.bf16.mxu1 %vm3697_vm0, %v3696_v62 }
  0xd2   : > { %3372 = vmatpush3.bf16.msra.mxu0 %v3653_v63 }
  0xd3   : > { %3373 = vmatprep.subr.bf16.mxu0 %v3696_v62 }
  0xd6   : > { %3374 = vmatpush3.bf16.msra.mxu0 %v3654_v0 }
  0xd7   : > { %3375 = vmatprep.subr.bf16.mxu0 %v3696_v62 }
  0xda   : > { %3376 = vmatpush3.bf16.msra.mxu0 %v3655_v1 }
  0xdb   : > { %3377 = vmatprep.subr.bf16.mxu0 %v3696_v62 }
  0xde   : > { %3378 = vmatpush3.bf16.msra.mxu0 %v3656_v2 }
  0xdf   : > { %3379 = vmatprep.subr.bf16.mxu0 %v3696_v62 }
  0xe2   : > { %3380 = vmatpush3.bf16.msra.mxu0 %v3657_v13  ;;  %v3660_v13 = vld [vmem:[%s4503_s2 + $0x78] sm:$0xff]  }
  0xe3   : > { %3381 = vmatprep.subr.bf16.mxu0 %v3696_v62  ;;  %3390 = vmatpush3.bf16.msra.mxu1 %v3660_v13 }
  0xe4   : > { %3391 = vmatprep.subr.bf16.mxu1 %v3696_v62 }
  0xe6   : > { %3382 = vmatpush3.bf16.msra.mxu0 %v3658_v16  ;;  %v3663_v16 = vld [vmem:[%s4503_s2 + $0x60] sm:$0xff]  }
  0xe7   : > { %3383 = vmatprep.subr.bf16.mxu0 %v3696_v62 }
  0xea   : > { %3384 = vmatpush3.bf16.msra.mxu0 %v3659_v17  ;;  %v3664_v17 = vld [vmem:[%s4503_s2 + $0x58] sm:$0xff]  }
  0xeb   : > { %3409 = vmatprep.subr.bf16.mxu0 %v3696_v62 }
  0xed   : > { %v3085_v48 = vpop.f32.mrf.mxu0 }
  0xee   : > { %v3107_v49 = vpop.f32.mrf.mxu1 }
  0xef   : > { %v3086_v51 = vpop.f32.mrf.mxu0 }
  0xf0   : > { %v3108_v52 = vpop.f32.mrf.mxu1  ;;  %v3087_v53 = vadd.f32 %v3086_v51, %v3085_v48 }
  0xf1   : > { %v3109_v54 = vadd.f32 %v3108_v52, %v3107_v49  ;;  %v3088_v55 = vpop.f32.mrf.mxu0 }
  0xf2   : > { %v3110_v56 = vpop.f32.mrf.mxu1  ;;  %v1821_v57 = vadd.f32 %v3087_v53, %v2790_v50 }
  0xf3   : > { %v3089_v58 = vpop.f32.mrf.mxu0 }
  0xf4   : > { %v3111_v59 = vpop.f32.mrf.mxu1  ;;  %v1861_v60 = vadd.f32 %v3109_v54, %v1821_v57 }
 0x10d   : > { %v3129_v3 = vpop.f32.mrf.mxu0 }
 0x10e   : > { %v3151_v4 = vpop.f32.mrf.mxu1 }
 0x10f   : > { %v3130_v5 = vpop.f32.mrf.mxu0 }
 0x110   : > { %v3131_v6 = vadd.f32 %v3130_v5, %v3129_v3  ;;  %v3152_v7 = vpop.f32.mrf.mxu1  ;;  %v2983_v5 = vld [vmem:[%s4504_s3 + $0x1] ss:$0 sm:$0xff] }
 0x111   : > { %v3153_v8 = vadd.f32 %v3152_v7, %v3151_v4  ;;  %v3132_v9 = vpop.f32.mrf.mxu0 }
 0x112   : > { %v1901_v10 = vadd.f32 %v3131_v6, %v1861_v60  ;;  %v3154_v11 = vpop.f32.mrf.mxu1 }
 0x113   : > { %v3133_v12 = vpop.f32.mrf.mxu0 }
 0x114   : > { %v1941_v14 = vadd.f32 %v3153_v8, %v1901_v10  ;;  %v3155_v15 = vpop.f32.mrf.mxu1 }
 0x115   : > { %v3662_v15 = vld [vmem:[%s4503_s2 + $0x68] sm:$0xff]  }
 0x12d   : > { %v3173_v18 = vpop.f32.mrf.mxu0 }
 0x12e   : > { %v3195_v19 = vpop.f32.mrf.mxu1 }
 0x12f   : > { %v3174_v20 = vpop.f32.mrf.mxu0 }
 0x130   : > { %v3175_v21 = vadd.f32 %v3174_v20, %v3173_v18  ;;  %v3196_v22 = vpop.f32.mrf.mxu1  ;;  %v3665_v18 = vld [vmem:[%s4503_s2 + $0x50] sm:$0xff]   ;;  %v3667_v20 = vld [vmem:[%s4503_s2 + $0x40] sm:$0xff]  }
 0x131   : > { %v3197_v23 = vadd.f32 %v3196_v22, %v3195_v19  ;;  %v3176_v24 = vpop.f32.mrf.mxu0  ;;  %v3666_v19 = vld [vmem:[%s4503_s2 + $0x48] sm:$0xff]   ;;  %v3669_v22 = vld [vmem:[%s4503_s2 + $0xb0] sm:$0xff]  }
 0x132   : > { %v1981_v25 = vadd.f32 %v3175_v21, %v1941_v14  ;;  %v3198_v26 = vpop.f32.mrf.mxu1  ;;  %v3661_v14 = vld [vmem:[%s4503_s2 + $0x70] sm:$0xff]   ;;  %v3668_v21 = vld [vmem:[%s4503_s2 + $0xb8] sm:$0xff]   ;;  %v3671_v24 = vld [vmem:[%s4503_s2 + $0xa0] sm:$0xff]  }
 0x133   : > { %v3177_v27 = vpop.f32.mrf.mxu0  ;;  %3392 = vmatpush3.bf16.msra.mxu1 %v3661_v14  ;;  %v3673_v26 = vld [vmem:[%s4503_s2 + $0x90] sm:$0xff]  }
 0x134   : > { %v2021_v28 = vadd.f32 %v3197_v23, %v1981_v25  ;;  %v3199_v29 = vpop.f32.mrf.mxu1  ;;  %3393 = vmatprep.subr.bf16.mxu1 %v3696_v62  ;;  %v3670_v23 = vld [vmem:[%s4503_s2 + $0xa8] sm:$0xff]   ;;  %v3672_v25 = vld [vmem:[%s4503_s2 + $0x98] sm:$0xff]  }
 0x137   : > { %3394 = vmatpush3.bf16.msra.mxu1 %v3662_v15 }
 0x138   : > { %3395 = vmatprep.subr.bf16.mxu1 %v3696_v62 }
 0x13b   : > { %3396 = vmatpush3.bf16.msra.mxu1 %v3663_v16 }
 0x13c   : > { %3397 = vmatprep.subr.bf16.mxu1 %v3696_v62 }
 0x13f   : > { %3398 = vmatpush3.bf16.msra.mxu1 %v3664_v17 }
 0x140   : > { %3399 = vmatprep.subr.bf16.mxu1 %v3696_v62 }
 0x143   : > { %3400 = vmatpush3.bf16.msra.mxu1 %v3665_v18 }
 0x144   : > { %3401 = vmatprep.subr.bf16.mxu1 %v3696_v62 }
 0x147   : > { %3402 = vmatpush3.bf16.msra.mxu1 %v3666_v19 }
 0x148   : > { %3403 = vmatprep.subr.bf16.mxu1 %v3696_v62 }
 0x14b   : > { %3404 = vmatpush3.bf16.msra.mxu1 %v3667_v20 }
 0x14c   : > { %3429 = vmatprep.subr.bf16.mxu1 %v3696_v62 }
 0x14d   : > { %v3217_v30 = vpop.f32.mrf.mxu0 }
 0x14e   : > { %v3239_v31 = vpop.f32.mrf.mxu1 }
 0x14f   : > { %v3218_v32 = vpop.f32.mrf.mxu0 }
 0x150   : > { %v3240_v33 = vpop.f32.mrf.mxu1  ;;  %v3219_v46 = vadd.f32 %v3218_v32, %v3217_v30 }
 0x151   : > { %v3220_v34 = vpop.f32.mrf.mxu0  ;;  %v3241_v48 = vadd.f32 %v3240_v33, %v3239_v31 }
 0x152   : > { %v3242_v35 = vpop.f32.mrf.mxu1  ;;  %v2061_v47 = vadd.f32 %v3219_v46, %v2021_v28  ;;  %v3008_v46 = vld [vmem:[%s4504_s3 + $0x2] ss:$0 sm:$0xff] }
 0x153   : > { %v3221_v36 = vpop.f32.mrf.mxu0 }
 0x154   : > { %v3243_v37 = vpop.f32.mrf.mxu1  ;;  %v2101_v50 = vadd.f32 %v3241_v48, %v2061_v47 }
 0x16d   : > { %v3261_v38 = vpop.f32.mrf.mxu0 }
 0x16e   : > { %v3283_v39 = vpop.f32.mrf.mxu1 }
 0x16f   : > { %v3262_v40 = vpop.f32.mrf.mxu0 }
 0x170   : > { %v3284_v41 = vpop.f32.mrf.mxu1  ;;  %v3263_v49 = vadd.f32 %v3262_v40, %v3261_v38  ;;  %v3674_v38 = vld [vmem:[%s4503_s2 + $0x88] sm:$0xff]   ;;  %v3676_v40 = vld [vmem:[%s4503_s2 + $0xf8] sm:$0xff]  }
 0x171   : > { %v3264_v42 = vpop.f32.mrf.mxu0  ;;  %v3285_v52 = vadd.f32 %v3284_v41, %v3283_v39  ;;  %v3675_v39 = vld [vmem:[%s4503_s2 + $0x80] sm:$0xff]   ;;  %v3677_v41 = vld [vmem:[%s4503_s2 + $0xf0] sm:$0xff]  }
 0x172   : > { %v3286_v43 = vpop.f32.mrf.mxu1  ;;  %v2141_v51 = vadd.f32 %v3263_v49, %v2101_v50  ;;  %v3678_v42 = vld [vmem:[%s4503_s2 + $0xe8] sm:$0xff]  }
 0x173   : > { %v3265_v44 = vpop.f32.mrf.mxu0  ;;  %v3679_v43 = vld [vmem:[%s4503_s2 + $0xe0] sm:$0xff]  }
 0x174   : > { %v3287_v45 = vpop.f32.mrf.mxu1  ;;  %v2181_v56 = vadd.f32 %v3285_v52, %v2141_v51  ;;  %v3680_v44 = vld [vmem:[%s4503_s2 + $0xd8] sm:$0xff]  }
 0x175   : > { %v3681_v45 = vld [vmem:[%s4503_s2 + $0xd0] sm:$0xff]  }
 0x18d   : > { %v3305_v53 = vpop.f32.mrf.mxu0 }
 0x18e   : > { %v3327_v54 = vpop.f32.mrf.mxu1 }
 0x18f   : > { %v3306_v55 = vpop.f32.mrf.mxu0 }
 0x190   : > { %v3307_v57 = vadd.f32 %v3306_v55, %v3305_v53  ;;  %v3328_v58 = vpop.f32.mrf.mxu1  ;;  %v3683_v55 = vld [vmem:[%s4503_s2 + $0xc0] sm:$0xff]  }
 0x191   : > { %v3308_v59 = vpop.f32.mrf.mxu0  ;;  %v3329_v61 = vadd.f32 %v3328_v58, %v3327_v54  ;;  %v3682_v54 = vld [vmem:[%s4503_s2 + $0xc8] sm:$0xff]  }
 0x192   : > { %v2221_v60 = vadd.f32 %v3307_v57, %v2181_v56  ;;  %v3330_v63 = vpop.f32.mrf.mxu1  ;;  %v3033_v56 = vld [vmem:[%s4504_s3 + $0x3] ss:$0 sm:$0xff] }
 0x193   : > { %v3309_v0 = vpop.f32.mrf.mxu0 }
 0x194   : > { %v2261_v1 = vadd.f32 %v3329_v61, %v2221_v60  ;;  %v3331_v2 = vpop.f32.mrf.mxu1 }
 0x196   : > { %v2266_v3 = vmax.f32 %v2261_v1, 0.0 }
 0x198   : > { %v2267_v4 = vpack.c.bf16 %v2266_v3, %v2266_v3 }
 0x19a   : > { %3386 = vmatmul.mubr.bf16.vlgmr.msra.gmra.mxu0 %v2267_v4 }
 0x19b   : > { %3425 = vmatprep.mubr.msk.bf16.mxu0 %vm3697_vm0, %v3696_v62  ;;  %3410 = vmatpush3.bf16.msra.mxu0 %v3668_v21 }
 0x19c   : > { %3411 = vmatprep.subr.bf16.mxu0 %v3696_v62 }
 0x19f   : > { %3412 = vmatpush3.bf16.msra.mxu0 %v3669_v22 }
 0x1a0   : > { %3413 = vmatprep.subr.bf16.mxu0 %v3696_v62 }
 0x1a3   : > { %3414 = vmatpush3.bf16.msra.mxu0 %v3670_v23 }
 0x1a4   : > { %3415 = vmatprep.subr.bf16.mxu0 %v3696_v62 }
 0x1a7   : > { %3416 = vmatpush3.bf16.msra.mxu0 %v3671_v24 }
 0x1a8   : > { %3417 = vmatprep.subr.bf16.mxu0 %v3696_v62 }
 0x1ab   : > { %3418 = vmatpush3.bf16.msra.mxu0 %v3672_v25 }
 0x1ac   : > { %3419 = vmatprep.subr.bf16.mxu0 %v3696_v62 }
 0x1af   : > { %3420 = vmatpush3.bf16.msra.mxu0 %v3673_v26 }
 0x1b0   : > { %3421 = vmatprep.subr.bf16.mxu0 %v3696_v62 }
 0x1b3   : > { %3422 = vmatpush3.bf16.msra.mxu0 %v3674_v38 }
 0x1b4   : > { %3423 = vmatprep.subr.bf16.mxu0 %v3696_v62 }
 0x1b7   : > { %3424 = vmatpush3.bf16.msra.mxu0 %v3675_v39 }
 0x25a   : > { %v2371_v6 = vpop.f32.mrf.mxu0 }
 0x25b   : > { %v2372_v7 = vadd.f32 %v2983_v5, %v2371_v6 }
 0x25c   : > { %v3387_v8 = vpop.f32.mrf.mxu0 }
 0x25d   : > { %v2377_v9 = vmax.f32 %v2372_v7, 0.0 }
 0x25e   : > { %v2374_v10 = vpop.f32.mrf.mxu0 }
 0x25f   : > { %v2378_v11 = vmul.f32 %v2377_v9, %v2377_v9 }
 0x260   : > { %v3388_v12 = vpop.f32.mrf.mxu0 }
 0x261   : > { %2379 = vadd.xlane.f32.xlu0 %v2378_v11 }
 0x2ea   : > { %v2380_v27 = vpop.xlane.xlu0 %2379 }
 0x2eb   : > { %v2382_v28 = vmul.f32 0.0078125, %v2380_v27 }
 0x2ed   : > { %3684 = vrsqrt.f32 %v2382_v28  ;;  %vm2385_vm1 = vcmp.eq.f32.partialorder %v2382_v28, inf  ;;  %v2388_v31 = vand.u32 2147483648, %v2382_v28  ;;  %vm2387_vm2 = vcmp.eq.f32.partialorder %v2382_v28, 0.0 }
 0x2fa   : > { %v3685_v29 = vpop.eup %3684 }
 0x2fb   : > { %v2384_v30 = vmul.f32 %v3685_v29, %v2382_v28 }
 0x2fd   : > { %v2386_v32 = vsel %vm2385_vm1, %v2382_v28, %v2384_v30 }
 0x2fe   : > { %v2389_v33 = vsel %vm2387_vm2, %v2388_v31, %v2386_v32 }
 0x2ff   : > { %v2390_v34 = vadd.f32 1e-08, %v2389_v33 }
 0x301   : > { %3686 = vrcp.f32 %v2390_v34 }
 0x30e   : > { %v3687_v35 = vpop.eup %3686 }
 0x30f   : > { %v2392_v36 = vmul.f32 %v3687_v35, %v2377_v9 }
 0x311   : > { %v2393_v37 = vpack.c.bf16 %v2392_v36, %v2392_v36 }
 0x313   : > { %3406 = vmatmul.mubr.bf16.vlgmr.msra.gmra.mxu1 %v2393_v37 }
 0x314   : > { %3445 = vmatprep.mubr.msk.bf16.mxu1 %vm3697_vm0, %v3696_v62  ;;  %3430 = vmatpush3.bf16.msra.mxu1 %v3676_v40 }
 0x315   : > { %3431 = vmatprep.subr.bf16.mxu1 %v3696_v62 }
 0x318   : > { %3432 = vmatpush3.bf16.msra.mxu1 %v3677_v41 }
 0x319   : > { %3433 = vmatprep.subr.bf16.mxu1 %v3696_v62 }
 0x31c   : > { %3434 = vmatpush3.bf16.msra.mxu1 %v3678_v42 }
 0x31d   : > { %3435 = vmatprep.subr.bf16.mxu1 %v3696_v62 }
 0x320   : > { %3436 = vmatpush3.bf16.msra.mxu1 %v3679_v43 }
 0x321   : > { %3437 = vmatprep.subr.bf16.mxu1 %v3696_v62 }
 0x324   : > { %3438 = vmatpush3.bf16.msra.mxu1 %v3680_v44 }
 0x325   : > { %3439 = vmatprep.subr.bf16.mxu1 %v3696_v62 }
 0x328   : > { %3440 = vmatpush3.bf16.msra.mxu1 %v3681_v45 }
 0x329   : > { %3441 = vmatprep.subr.bf16.mxu1 %v3696_v62 }
 0x32c   : > { %3442 = vmatpush3.bf16.msra.mxu1 %v3682_v54 }
 0x32d   : > { %3443 = vmatprep.subr.bf16.mxu1 %v3696_v62  ;;  %v3058_v62 = vld [vmem:[%s4504_s3 + $0x4] ss:$0 sm:$0xff] }
 0x330   : > { %3444 = vmatpush3.bf16.msra.mxu1 %v3683_v55 }
 0x3d3   : > { %v2498_v47 = vpop.f32.mrf.mxu1 }
 0x3d4   : > { %v2499_v48 = vadd.f32 %v3008_v46, %v2498_v47 }
 0x3d5   : > { %v3407_v49 = vpop.f32.mrf.mxu1 }
 0x3d6   : > { %v2504_v50 = vmax.f32 %v2499_v48, 0.0 }
 0x3d7   : > { %v2501_v51 = vpop.f32.mrf.mxu1 }
 0x3d8   : > { %v2505_v52 = vpack.c.bf16 %v2504_v50, %v2504_v50 }
 0x3d9   : > { %v3408_v53 = vpop.f32.mrf.mxu1 }
 0x3da   : > { %3426 = vmatmul.mubr.bf16.vlgmr.msra.gmra.mxu0 %v2505_v52 }
 0x49a   : > { %v2610_v57 = vpop.f32.mrf.mxu0 }
 0x49b   : > { %v2611_v58 = vadd.f32 %v3033_v56, %v2610_v57 }
 0x49c   : > { %v3427_v59 = vpop.f32.mrf.mxu0 }
 0x49d   : > { %v2616_v60 = vmax.f32 %v2611_v58, 0.0 }
 0x49e   : > { %v2613_v61 = vpop.f32.mrf.mxu0 }
 0x49f   : > { %v2617_v63 = vpack.c.bf16 %v2616_v60, %v2616_v60 }
 0x4a0   : > { %v3428_v0 = vpop.f32.mrf.mxu0 }
 0x4a1   : > { %3446 = vmatmul.mubr.bf16.vlgmr.msra.gmra.mxu1 %v2617_v63 }
 0x561   : > { %v2722_v1 = vpop.f32.mrf.mxu1 }
 0x562   : > { %v2723_v2 = vadd.f32 %v3058_v62, %v2722_v1 }
 0x563   : > { %v3447_v3 = vpop.f32.mrf.mxu1 }
 0x564   : > { %v2728_v4 = vpack.c.bf16 %v2723_v2, %v2723_v2 }
 0x565   : > { %v2725_v5 = vpop.f32.mrf.mxu1 }
 0x566   : > { %2729 = vst [vmem:[%s195_s13] sm:$0xf] %v2728_v4 }
 0x567   : > { %v3448_v6 = vpop.f32.mrf.mxu1 }
 0x568 PF: > { %s14_s15 = sadd.s32 1, %s3694_s15  }
 0x569   : > { %p11_p4 = scmp.ge.s32.totalorder %s14_s15, 4  }
 0x56b   :  { %13 = sbr.rel (!%p11_p4) target bundleno = 1 (0x1), region = 69 }

</bundles_post_ra>
